<compile_context>
chip_gen: v5e
topology: v5e:2x2
jax: 0.10.0
libtpu: 0.0.40
codegen_flags: <defaults>
</compile_context>

<pallas_src>
import functools

import jax
import jax.numpy as jnp
from jax import lax
from jax.experimental import pallas as pl
from jax.experimental.pallas import tpu as pltpu


def _round_up(x: int, m: int) -> int:
    return (x + m - 1) // m * m


def _cdiv(a: int, b: int) -> int:
    return (a + b - 1) // b


def _vmem_capacity_bytes() -> int:
    """Physical VMEM per TensorCore; conservative v7x default if the query fails."""
    try:
        cap = int(pltpu.get_tpu_info().vmem_capacity_bytes)
        if cap > 0:
            return cap
    except Exception:
        pass
    return 64 * 1024 * 1024  # v7x per-TC VMEM (v5e/v6e have 128 MiB)


def _epilogue(z, *, last_layer, negative_slope, valid_n, out_dtype):
    """Bias already added. LeakyReLU (hidden) or softmax over dim=1 (last layer)."""
    if last_layer:
        if valid_n < z.shape[1]:
            # Large FINITE negative mask: padded batch rows then see finite max,
            # exp(-1e30 - m) underflows to 0, so no NaNs in the padded buffer.
            lane = lax.broadcasted_iota(jnp.int32, z.shape, 1)
            z = jnp.where(lane < valid_n, z, jnp.float32(-1e30))
        m = jnp.max(z, axis=1, keepdims=True)
        e = jnp.exp(z - m)
        denom = jnp.sum(e, axis=1, keepdims=True)
        # approx reciprocal uses the EUP slot (~free); rows sum to 1 within ~1e-3.
        return (e * pl.reciprocal(denom, approx=True)).astype(out_dtype)
    # LeakyReLU(negative_slope); Dropout is identity in eval mode.
    # TODO(synk): training-mode dropout (pltpu.prng_* mask) not implemented; eval semantics only.
    return jnp.where(z >= 0, z, negative_slope * z).astype(out_dtype)


def _ffn_kernel_single_k(x_ref, w_ref, b_ref, o_ref, *,
                         last_layer, negative_slope, valid_n):
    # grid = (M_tiles, N_tiles); whole K resident -> no accumulator scratch needed.
    z = jnp.dot(x_ref[...], w_ref[...], preferred_element_type=jnp.float32)
    z = z + b_ref[...].astype(jnp.float32)
    o_ref[...] = _epilogue(z, last_layer=last_layer, negative_slope=negative_slope,
                           valid_n=valid_n, out_dtype=o_ref.dtype)


def _ffn_kernel_multi_k(x_ref, w_ref, b_ref, o_ref, acc_ref, *,
                        last_layer, negative_slope, valid_n):
    # grid = (M_tiles, N_tiles, K_tiles); resident f32 accumulator along K.
    k = pl.program_id(2)

    @pl.when(k == 0)
    def _():
        acc_ref[...] = jnp.zeros_like(acc_ref)

    acc_ref[...] += jnp.dot(x_ref[...], w_ref[...],
                            preferred_element_type=jnp.float32)

    @pl.when(k == pl.num_programs(2) - 1)
    def _():
        z = acc_ref[...] + b_ref[...].astype(jnp.float32)
        o_ref[...] = _epilogue(z, last_layer=last_layer,
                               negative_slope=negative_slope,
                               valid_n=valid_n, out_dtype=o_ref.dtype)


class SingleFeedForwardNN:
    """Pallas-TPU forward pass of the PyTorch SingleFeedForwardNN (eval mode).

    weight: [output_dim, input_dim]  (PyTorch nn.Linear layout)
    bias:   [output_dim]

    Weight is transposed to [K, N], zero-padded and cast to `operand_dtype`
    ONCE at construction.  Accumulation is always f32.
    """

    def __init__(self, weight, bias, *, last_layer=False, dropout_rate=None,
                 negative_slope=0.2, operand_dtype=jnp.bfloat16,
                 out_dtype=jnp.float32):
        output_dim, input_dim = weight.shape
        self.input_dim = int(input_dim)
        self.output_dim = int(output_dim)
        self.last_layer = bool(last_layer)
        self.negative_slope = float(negative_slope)
        self.operand_dtype = jnp.dtype(operand_dtype)
        self.out_dtype = jnp.dtype(out_dtype)
        del dropout_rate  # eval mode: Dropout is identity

        self.vmem_cap = _vmem_capacity_bytes()
        # headroom for Mosaic internal scratch / compiler temporaries
        self.vmem_budget = max(16 * 1024 * 1024, self.vmem_cap - 12 * 1024 * 1024)

        # ---- static (batch-independent) tiling of K and N -------------------
        k_full = _round_up(self.input_dim, 128)
        n_full = _round_up(self.output_dim, 128)

        # K: keep whole axis per step when possible (collapses the reduction grid).
        self.grid_k = _cdiv(k_full, 2048)
        self.tk = _round_up(_cdiv(k_full, self.grid_k), 128)
        self.k_pad = self.tk * self.grid_k

        if self.last_layer:
            # Softmax over dim=1 needs the whole feature axis resident per M tile.
            # TODO(synk): online softmax over N tiles for very large classifier heads.
            self.grid_n = 1
            self.tn = n_full
        else:
            self.grid_n = _cdiv(n_full, 512)
            self.tn = _round_up(_cdiv(n_full, self.grid_n), 128)
        self.n_pad = self.tn * self.grid_n

        # ---- one-time weight/bias preparation (transpose + pad + cast) ------
        w_t = jnp.transpose(weight).astype(jnp.float32)              # [K, N]
        w_t = jnp.pad(w_t, ((0, self.k_pad - self.input_dim),
                            (0, self.n_pad - self.output_dim)))
        self.w_prepared = w_t.astype(self.operand_dtype)             # [k_pad, n_pad]
        self.b_prepared = jnp.pad(
            bias.astype(jnp.float32).reshape(1, -1),
            ((0, 0), (0, self.n_pad - self.output_dim)))             # [1, n_pad] f32

    # ------------------------------------------------------------------------
    def _vmem_needed(self, tm, multi_k):
        op = self.operand_dtype.itemsize
        out = self.out_dtype.itemsize
        return (2 * (tm * self.tk + self.tk * self.tn) * op   # double-buffered x/W tiles
                + 2 * tm * self.tn * out                      # double-buffered output tiles
                + (tm * self.tn * 4 if multi_k else 0)        # f32 accumulator
                + 2 * self.tn * 4)                            # bias tile

    def _choose_tm(self, batch):
        m_min = _round_up(batch, 8)
        # target 256-row tiles (fills the 256-wide MXU on v6e/v7x; fine on v5e)
        desired = max(1, _cdiv(m_min, 256))
        # v7x megacore: guarantee >=2 blocks on a "parallel" axis when batch allows
        if self.grid_n * desired < 2 and m_min >= 16:
            desired = 2
        tm = _round_up(_cdiv(batch, desired), 8)
        # shrink the M tile until the working set fits the VMEM budget
        while tm > 8 and self._vmem_needed(tm, self.grid_k > 1) > self.vmem_budget:
            tm = _round_up(_cdiv(tm, 2), 8)
        return tm

    def __call__(self, x):
        batch = x.shape[0]
        assert x.shape[1] == self.input_dim
        tm = self._choose_tm(batch)
        m_pad = _round_up(batch, tm)
        grid_m = m_pad // tm

        x_p = x.astype(self.operand_dtype)
        if m_pad != batch or self.k_pad != self.input_dim:
            x_p = jnp.pad(x_p, ((0, m_pad - batch),
                                (0, self.k_pad - self.input_dim)))

        op = self.operand_dtype.itemsize
        out_is = self.out_dtype.itemsize
        multi_k = self.grid_k > 1

        # truthful streaming estimate: x re-read per N tile, W re-read per M tile
        cost = pl.CostEstimate(
            flops=2 * m_pad * self.n_pad * self.k_pad,
            transcendentals=(m_pad * self.n_pad) if self.last_layer else 0,
            bytes_accessed=(self.grid_n * m_pad * self.k_pad * op
                            + grid_m * self.k_pad * self.n_pad * op
                            + m_pad * self.n_pad * out_is
                            + self.n_pad * 4),
        )

        vmem_needed = self._vmem_needed(tm, multi_k)
        vmem_limit = int(min(self.vmem_budget,
                             max(32 * 1024 * 1024, 2 * vmem_needed)))

        common = dict(last_layer=self.last_layer,
                      negative_slope=self.negative_slope,
                      valid_n=self.output_dim)

        if not multi_k:
            kernel = functools.partial(_ffn_kernel_single_k, **common)
            grid_spec = pltpu.PrefetchScalarGridSpec(
                num_scalar_prefetch=0,
                grid=(grid_m, self.grid_n),
                in_specs=[
                    pl.BlockSpec((tm, self.tk), lambda i, j: (i, 0)),        # x
                    pl.BlockSpec((self.tk, self.tn), lambda i, j: (0, j)),   # W^T [K,N]
                    pl.BlockSpec((1, self.tn), lambda i, j: (0, j)),         # bias
                ],
                out_specs=pl.BlockSpec((tm, self.tn), lambda i, j: (i, j)),
            )
            dims = ("parallel", "parallel")
        else:
            kernel = functools.partial(_ffn_kernel_multi_k, **common)
            grid_spec = pltpu.PrefetchScalarGridSpec(
                num_scalar_prefetch=0,
                grid=(grid_m, self.grid_n, self.grid_k),
                in_specs=[
                    pl.BlockSpec((tm, self.tk), lambda i, j, k: (i, k)),        # x
                    pl.BlockSpec((self.tk, self.tn), lambda i, j, k: (k, j)),   # W^T [K,N]
                    pl.BlockSpec((1, self.tn), lambda i, j, k: (0, j)),         # bias
                ],
                out_specs=pl.BlockSpec((tm, self.tn), lambda i, j, k: (i, j)),
                scratch_shapes=[pltpu.VMEM((tm, self.tn), jnp.float32)],
            )
            dims = ("parallel", "parallel", "arbitrary")

        out = pl.pallas_call(
            kernel,
            out_shape=jax.ShapeDtypeStruct((m_pad, self.n_pad), self.out_dtype),
            grid_spec=grid_spec,
            compiler_params=pltpu.CompilerParams(
                dimension_semantics=dims, vmem_limit_bytes=vmem_limit),
            cost_estimate=cost,
        )(x_p, self.w_prepared, self.b_prepared)

        if m_pad != batch or self.n_pad != self.output_dim:
            out = out[:batch, :self.output_dim]
        return out


# ----------------------------------------------------------------------------
def _xavier_uniform(key, out_dim, in_dim):
    # matches nn.init.xavier_uniform_ (gain=1)
    limit = jnp.sqrt(6.0 / (in_dim + out_dim))
    return jax.random.uniform(key, (out_dim, in_dim), jnp.float32,
                              minval=-limit, maxval=limit)


def _ref_forward(x, weight, bias, last_layer, negative_slope=0.2):
    z = x @ weight.T + bias
    if last_layer:
        return jax.nn.softmax(z, axis=1)
    return jnp.where(z >= 0, z, negative_slope * z)


if __name__ == "__main__":
    # ---- small, module-scale shapes (exact f32 path) -------------------------
    k1, k2, k3 = jax.random.split(jax.random.PRNGKey(0), 3)
    batch, input_dim, output_dim = 8, 32, 16
    x = jax.random.normal(k1, (batch, input_dim), jnp.float32)
    weight = _xavier_uniform(k2, output_dim, input_dim)
    bound = 1.0 / jnp.sqrt(jnp.float32(input_dim))
    bias = jax.random.uniform(k3, (output_dim,), jnp.float32,
                              minval=-bound, maxval=bound)

    ffn_hidden_f32 = SingleFeedForwardNN(weight, bias, last_layer=False,
                                         operand_dtype=jnp.float32)
    ffn_last_f32 = SingleFeedForwardNN(weight, bias, last_layer=True,
                                       operand_dtype=jnp.float32)
    out_hidden = ffn_hidden_f32(x)
    out_last = ffn_last_f32(x)
    jax.block_until_ready((out_hidden, out_last))
    assert jnp.allclose(out_hidden, _ref_forward(x, weight, bias, False),
                        atol=1e-4, rtol=1e-4)
    assert jnp.allclose(out_last, _ref_forward(x, weight, bias, True),
                        atol=2e-3, rtol=2e-3)

    # default bf16 operands (f32 accumulation) -- looser check
    ffn_hidden_bf16 = SingleFeedForwardNN(weight, bias, last_layer=False)
    out_hidden_bf16 = ffn_hidden_bf16(x)
    jax.block_until_ready(out_hidden_bf16)
    assert float(jnp.max(jnp.abs(out_hidden_bf16 - out_hidden))) < 5e-2

    # ---- larger shapes: 2 M-tiles (v7x megacore), full-K / full-N tiles -------
    k4, k5, k6 = jax.random.split(jax.random.PRNGKey(1), 3)
    batch2, in2, out2 = 200, 1024, 384
    x2 = jax.random.normal(k4, (batch2, in2), jnp.float32)
    w2 = _xavier_uniform(k5, out2, in2)
    bound2 = 1.0 / jnp.sqrt(jnp.float32(in2))
    b2 = jax.random.uniform(k6, (out2,), jnp.float32, minval=-bound2, maxval=bound2)

    ffn2_hidden = SingleFeedForwardNN(w2, b2, last_layer=False,
                                      operand_dtype=jnp.float32)
    ffn2_last = SingleFeedForwardNN(w2, b2, last_layer=True,
                                    operand_dtype=jnp.float32)
    out2_hidden = ffn2_hidden(x2)
    out2_last = ffn2_last(x2)
    jax.block_until_ready((out2_hidden, out2_last))
    assert jnp.allclose(out2_hidden, _ref_forward(x2, w2, b2, False),
                        atol=5e-2, rtol=5e-2)
    assert jnp.allclose(out2_last, _ref_forward(x2, w2, b2, True),
                        atol=1e-2, rtol=1e-2)

    # default bf16 weights + bf16 hidden-layer output (halves writeback bytes)
    ffn2_bf16 = SingleFeedForwardNN(w2, b2, last_layer=False,
                                    out_dtype=jnp.bfloat16)
    out2_bf16 = ffn2_bf16(x2)
    jax.block_until_ready(out2_bf16)
    assert float(jnp.max(jnp.abs(out2_bf16.astype(jnp.float32) - out2_hidden))) < 0.1

    # ---- K large enough to exercise the multi-K accumulator path -------------
    k7, k8, k9 = jax.random.split(jax.random.PRNGKey(2), 3)
    batch3, in3, out3 = 64, 4096, 256
    x3 = jax.random.normal(k7, (batch3, in3), jnp.float32)
    w3 = _xavier_uniform(k8, out3, in3)
    bound3 = 1.0 / jnp.sqrt(jnp.float32(in3))
    b3 = jax.random.uniform(k9, (out3,), jnp.float32, minval=-bound3, maxval=bound3)

    ffn3 = SingleFeedForwardNN(w3, b3, last_layer=False, operand_dtype=jnp.float32)
    out3_hidden = ffn3(x3)
    jax.block_until_ready(out3_hidden)
    assert jnp.allclose(out3_hidden, _ref_forward(x3, w3, b3, False),
                        atol=5e-2, rtol=5e-2)

    print("KERNEL_OK")
</pallas_src>

<mosaic_0001>
module attributes {stable_mosaic.version = 11 : i64} {
  func.func @_ffn_kernel_single_k(%arg0: i32, %arg1: i32, %arg2: memref<8x128xf32, #tpu.memory_space<vmem>>, %arg3: memref<128x128xf32, #tpu.memory_space<vmem>>, %arg4: memref<1x128xf32, #tpu.memory_space<vmem>>, %arg5: memref<8x128xf32, #tpu.memory_space<vmem>>) attributes {dimension_semantics = [#tpu.dimension_semantics<parallel>, #tpu.dimension_semantics<parallel>], iteration_bounds = array<i64: 1, 1>, scalar_prefetch = 0 : i64, scratch_operands = 0 : i64, tpu.core_type = #tpu.core_type<tc>, window_params = [{transform_indices = @transform_0, window_bounds = array<i64: 8, 128>}, {transform_indices = @transform_1, window_bounds = array<i64: 128, 128>}, {transform_indices = @transform_2, window_bounds = array<i64: 1, 128>}, {transform_indices = @transform_3, window_bounds = array<i64: 8, 128>}]} {
    %c0 = arith.constant 0 : index
    %c0_0 = arith.constant 0 : index
    %0 = vector.load %arg2[%c0, %c0_0] : memref<8x128xf32, #tpu.memory_space<vmem>>, vector<8x128xf32>
    %c0_1 = arith.constant 0 : index
    %c0_2 = arith.constant 0 : index
    %1 = vector.load %arg3[%c0_1, %c0_2] : memref<128x128xf32, #tpu.memory_space<vmem>>, vector<128x128xf32>
    %cst = arith.constant dense<0.000000e+00> : vector<8x128xf32>
    %2 = tpu.matmul %0, %1, %cst {dimension_numbers = #tpu.dot_dimension_numbers<[1], [0], [0], [1], [0, 0, 1, 1], [], []>} : vector<8x128xf32>, vector<128x128xf32>, vector<8x128xf32> -> vector<8x128xf32>
    %c0_3 = arith.constant 0 : index
    %c0_4 = arith.constant 0 : index
    %3 = vector.load %arg4[%c0_3, %c0_4] : memref<1x128xf32, #tpu.memory_space<vmem>>, vector<1x128xf32>
    %4 = vector.broadcast %3 : vector<1x128xf32> to vector<8x128xf32>
    %5 = arith.addf %2, %4 : vector<8x128xf32>
    %cst_5 = arith.constant 0.000000e+00 : f32
    %6 = vector.broadcast %cst_5 : f32 to vector<8x128xf32>
    %7 = arith.cmpf oge, %5, %6 : vector<8x128xf32>
    %cst_6 = arith.constant 2.000000e-01 : f32
    %8 = vector.broadcast %cst_6 : f32 to vector<8x128xf32>
    %9 = arith.mulf %8, %5 : vector<8x128xf32>
    %10 = arith.select %7, %5, %9 : vector<8x128xi1>, vector<8x128xf32>
    %c0_7 = arith.constant 0 : index
    %c0_8 = arith.constant 0 : index
    %11 = vector.load %arg5[%c0_7, %c0_8] : memref<8x128xf32, #tpu.memory_space<vmem>>, vector<8x128xf32>
    tpu.vector_store %arg5[%c0_7, %c0_8], %10 {strides = array<i32>} : memref<8x128xf32, #tpu.memory_space<vmem>>, vector<8x128xf32>,
    return
  }
  func.func @transform_0(%arg0: i32, %arg1: i32) -> (i32, i32) {
    %c0_i32 = arith.constant 0 : i32
    %c0_i32_0 = arith.constant 0 : i32
    return %arg0, %c0_i32 : i32, i32
  }
  func.func @transform_1(%arg0: i32, %arg1: i32) -> (i32, i32) {
    %c0_i32 = arith.constant 0 : i32
    %c0_i32_0 = arith.constant 0 : i32
    return %c0_i32, %arg1 : i32, i32
  }
  func.func @transform_2(%arg0: i32, %arg1: i32) -> (i32, i32) {
    %c0_i32 = arith.constant 0 : i32
    %c0_i32_0 = arith.constant 0 : i32
    return %c0_i32, %arg1 : i32, i32
  }
  func.func @transform_3(%arg0: i32, %arg1: i32) -> (i32, i32) {
    %c0_i32 = arith.constant 0 : i32
    return %arg0, %arg1 : i32, i32
  }
}

</mosaic_0001>

<bundles_post_ra>
// kernel: tpu_custom_call.1
= control target key start
LH: loop header
LB: loop body
LE: loop exit
PB: predicated region body
PF: predicated region fallthrough
CT: control target
= control target key end

     0   :  { %8 = vsyncpa [#allocation3], 0  ;;  %s229_s0 = inlined_call_operand.hbm [shape: f32[8,128], index: 0, kind: input, shape index: {}]   ;;  %s230_s1 = inlined_call_operand.hbm [shape: f32[128,128], index: 1, kind: input, shape index: {}]   ;;  %s231_s2 = inlined_call_operand.vmem [shape: f32[1,128], index: 2, kind: input, shape index: {}]   ;;  %s232_s3 = inlined_call_operand.hbm [shape: f32[8,128], index: 3, kind: output, shape index: {}]  }
   0x1   :  { %9 = vsyncpa [#allocation6], 0 }
   0x2   :  { %10 = vsyncpa [#allocation4], 0  ;;  %s16_s14 = sshll.u32 %s229_s0, 4  ;;  %s192_s15 = smov [#allocation2]   ;;  %s17_s14 = int_to_ptr.hbm [resolvable:$true] %s16_s14 }
   0x3   :  { %s18_s16 = sshll.u32 %s192_s15, 4  ;;  %s26_s19 = sshll.u32 %s230_s1, 4  ;;  %s19_s16 = int_to_ptr.vmem [resolvable:$true] %s18_s16  ;;  %s27_s19 = int_to_ptr.hbm [resolvable:$true] %s26_s19 }
   0x4   :  { %21 = dma.hbm_to_vmem [thread:$0]  %s17_s14, 128, %s19_s16, [#allocation3]  }
   0x5   :  { %s193_s20 = smov [#allocation5]   ;;  %s194_s22 = smov 128  }
   0x6   :  { %s28_s21 = sshll.u32 %s193_s20, 4  ;;  %s195_s23 = smov 8   ;;  %s29_s21 = int_to_ptr.vmem [resolvable:$true] %s28_s21 }
   0x7   :  { %34 = dma.hbm_to_vmem [thread:$0]  %s27_s19, 2048, %s29_s21, [#allocation6], %s194_s22, %s194_s22, %s195_s23  }
   0x8   :  { %186 = dma.done.wait [#allocation3], 128  }
   0x9   :  { %187 = vsyncadd [#allocation3], 4294967168 }
   0xa   :  { %188 = dma.done.wait [#allocation6], 2048  }
   0xb   :  { %189 = vsyncadd [#allocation6], 4294965248  ;;  %v61_v0 = vld [vmem:[#allocation5 + $0x78] sm:$0xff]  ;;  %v60_v1 = vld [vmem:[#allocation5 + $0x70] sm:$0xff]  ;;  %s196_s24 = smov [#allocation7]   ;;  %s97_s28 = sshll.u32 %s232_s3, 4  ;;  %s98_s28 = int_to_ptr.hbm [resolvable:$true] %s97_s28 }
   0xc   :  { %66 = vmatpush.msra.mxu0 %v61_v0  ;;  %v59_v2 = vld [vmem:[#allocation5 + $0x68] sm:$0xff]  ;;  %v58_v3 = vld [vmem:[#allocation5 + $0x60] sm:$0xff]  ;;  %v57_v4 = vld [vmem:[#allocation5 + $0x58] sm:$0xff]  ;;  %s95_s25 = sshll.u32 %s196_s24, 4  ;;  %s96_s25 = int_to_ptr.vmem [resolvable:$true] %s95_s25 }
   0xd   :  { %v56_v5 = vld [vmem:[#allocation5 + $0x50] sm:$0xff]  ;;  %v55_v6 = vld [vmem:[#allocation5 + $0x48] sm:$0xff]  ;;  %v54_v7 = vld [vmem:[#allocation5 + $0x40] sm:$0xff] }
   0xe   :  { %67 = vmatpush.msra.mxu0 %v60_v1  ;;  %v53_v8 = vld [vmem:[#allocation5 + $0x38] sm:$0xff]  ;;  %v52_v9 = vld [vmem:[#allocation5 + $0x30] sm:$0xff]  ;;  %v51_v10 = vld [vmem:[#allocation5 + $0x28] sm:$0xff] }
   0xf   :  { %v50_v11 = vld [vmem:[#allocation5 + $0x20] sm:$0xff]  ;;  %v49_v12 = vld [vmem:[#allocation5 + $0x18] sm:$0xff]  ;;  %v48_v13 = vld [vmem:[#allocation5 + $0x10] sm:$0xff] }
  0x10   :  { %68 = vmatpush.msra.mxu0 %v59_v2  ;;  %v47_v14 = vld [vmem:[#allocation5 + $0x8] sm:$0xff]  ;;  %v46_v15 = vld [vmem:[#allocation5] sm:$0xff]  ;;  %v45_v16 = vld [vmem:[#allocation2] sm:$0xff] }
  0x11   :  { %v113_v17 = vld [vmem:[%s231_s2] ss:$0 sm:$0xff] }
  0x12   :  { %69 = vmatpush.msra.mxu0 %v58_v3 }
  0x14   :  { %70 = vmatpush.msra.mxu0 %v57_v4 }
  0x16   :  { %71 = vmatpush.msra.mxu0 %v56_v5 }
  0x18   :  { %72 = vmatpush.msra.mxu0 %v55_v6 }
  0x1a   :  { %73 = vmatpush.msra.mxu0 %v54_v7 }
  0x1c   :  { %74 = vmatpush.msra.mxu0 %v53_v8 }
  0x1e   :  { %75 = vmatpush.msra.mxu0 %v52_v9 }
  0x20   :  { %76 = vmatpush.msra.mxu0 %v51_v10 }
  0x22   :  { %77 = vmatpush.msra.mxu0 %v50_v11 }
  0x24   :  { %78 = vmatpush.msra.mxu0 %v49_v12 }
  0x26   :  { %79 = vmatpush.msra.mxu0 %v48_v13 }
  0x28   :  { %80 = vmatpush.msra.mxu0 %v47_v14 }
  0x2a   :  { %81 = vmatpush.msra.mxu0 %v46_v15 }
  0x2b   :  { %82 = vmatmul.f32.vlgmr.msra.gmra.mxu0 %v45_v16 }
  0xa8   :  { %v83_v18 = vpop.f32.mrf.mxu0 }
  0xa9   :  { %v84_v19 = vadd.f32 %v113_v17, %v83_v18 }
  0xab   :  { %vm86_vm0 = vcmp.ge.f32.partialorder %v84_v19, 0.0  ;;  %v87_v20 = vmul.f32 0.2, %v84_v19 }
  0xad   :  { %v88_v21 = vsel %vm86_vm0, %v84_v19, %v87_v20 }
  0xae   :  { %89 = vst [vmem:[#allocation7] sm:$0xff] %v88_v21 }
  0xaf   :  { %100 = dma.vmem_to_hbm [thread:$0]  %s96_s25, 128, %s98_s28, [#allocation4]  }
  0xb0   :  { %190 = dma.done.wait [#allocation4], 128  }
  0xb1   :  { %191 = vsyncadd [#allocation4], 4294967168 }
  0xb2   :  { %105 = vsyncpa [#allocation3], 1 }
  0xb3   :  { %106 = vsyncpa [#allocation6], 1 }
  0xb4   :  { %107 = vsyncpa [#allocation4], 1 }

</bundles_post_ra>
